<compile_context>
chip_gen: v5e
topology: v5e:2x2
jax: 0.10.0
libtpu: 0.0.40
codegen_flags: <defaults>
</compile_context>

<pallas_src>
import functools

import jax
import jax.numpy as jnp
import numpy as np
from jax.experimental import pallas as pl
from jax.experimental.pallas import tpu as pltpu


# Fold the TT chain to a dense W (single matmul kernel) when the weight has at
# most this many elements; above it, use the streaming two-stage path.
_DENSE_W_MAX_ELEMS = 4 * 1024 * 1024
_MAX_TB = 256    # batch tile cap (conservative across v5e/v6e/v7x VMEM)
_MAX_TN = 512    # output tile cap
_MAX_TK = 512    # contraction tile cap (keeps double-buffered x/W blocks small)


def _round_up(x, m):
    return (x + m - 1) // m * m


def _pick_tile(n, unit, max_tile):
    """Largest tile (multiple of `unit`, <= max_tile) minimizing padding of n.

    Returns (tile, padded_n) with padded_n % tile == 0.
    """
    n_u = _round_up(max(n, unit), unit)
    cap = min(max_tile, n_u)
    best_t, best_pad = unit, n_u
    t = unit
    while t <= cap:
        pad = _round_up(n_u, t)
        if pad < best_pad or (pad == best_pad and t > best_t):
            best_t, best_pad = t, pad
        t += unit
    return best_t, best_pad


# ----------------------------------------------------------------------------
# Parameter setup (mirrors random_tt + uniform_(-0.1, 0.1) init, deterministic)
# ----------------------------------------------------------------------------
def make_tt_factors(key, shape, rank):
    """TT cores with ranks [1, rank, ..., rank, 1], init ~ U(-0.1, 0.1)."""
    n = len(shape)
    ranks = [1] + [rank] * (n - 1) + [1]
    factors = []
    for k in range(n):
        key, sub = jax.random.split(key)
        f = jax.random.uniform(
            sub, (ranks[k], shape[k], ranks[k + 1]),
            minval=-0.1, maxval=0.1, dtype=jnp.float32)
        factors.append(f)
    return factors


def tt_to_tensor(factors):
    """Plain-JAX reconstruction of the full tensor (tensorly-style chain)."""
    full_shape = tuple(f.shape[1] for f in factors)
    full = factors[0].reshape(full_shape[0], -1)
    for f in factors[1:]:
        r_prev = f.shape[0]
        full = full.reshape(-1, r_prev) @ f.reshape(r_prev, -1)
    return full.reshape(full_shape)


def _mode_boundary(shape, in_features):
    """Index m such that prod(shape[:m]) == in_features, or None."""
    prefix = 1
    for k in range(len(shape) + 1):
        if prefix == in_features:
            return k
        if k < len(shape):
            prefix *= shape[k]
    return None


def tt_split(factors, in_features):
    """Contract TT cores into A:(in_features, r_mid), B:(r_mid, out_features)
    with tt_to_tensor(factors).reshape(in_features, -1) == A @ B."""
    shape = tuple(f.shape[1] for f in factors)
    m = _mode_boundary(shape, in_features)
    assert m is not None and 0 < m < len(shape), (
        "in_features must equal the product of a leading subset of TT modes")

    A = factors[0].reshape(shape[0], -1)                       # (s0, r1)
    for k in range(1, m):
        r_k = factors[k].shape[0]
        A = A.reshape(-1, r_k) @ factors[k].reshape(r_k, -1)   # (P, s_k*r_{k+1})
        A = A.reshape(-1, factors[k].shape[2])                 # (P*s_k, r_{k+1})

    B = factors[-1].reshape(factors[-1].shape[0], -1)          # (r_{n-1}, s_{n-1})
    for k in range(len(shape) - 2, m - 1, -1):
        r_k, s_k, r_k1 = factors[k].shape
        B = factors[k].reshape(r_k * s_k, r_k1) @ B            # (r_k*s_k, Q)
        B = B.reshape(r_k, -1)                                 # (r_k, s_k*Q)
    return A, B


# ----------------------------------------------------------------------------
# Path 1: dense-fold kernel  y = x @ W  (K-tiled, f32 VMEM accumulator)
# ----------------------------------------------------------------------------
def _dense_matmul_kernel(x_ref, w_ref, o_ref, acc_ref):
    @pl.when(pl.program_id(2) == 0)
    def _():
        acc_ref[...] = jnp.zeros_like(acc_ref)

    acc_ref[...] += jnp.dot(x_ref[...], w_ref[...],
                            preferred_element_type=jnp.float32)

    @pl.when(pl.program_id(2) == pl.num_programs(2) - 1)
    def _():
        o_ref[...] = acc_ref[...].astype(o_ref.dtype)


def _dense_matmul(x_p, w_p, out_dtype, tb, tn, tk):
    b_pad, k_pad = x_p.shape
    _, n_pad = w_p.shape
    grid = (b_pad // tb, n_pad // tn, k_pad // tk)
    out_isz = np.dtype(out_dtype).itemsize
    cost = pl.CostEstimate(
        flops=2 * b_pad * k_pad * n_pad,
        transcendentals=0,
        bytes_accessed=(x_p.size * x_p.dtype.itemsize
                        + w_p.size * w_p.dtype.itemsize
                        + b_pad * n_pad * out_isz))
    return pl.pallas_call(
        _dense_matmul_kernel,
        out_shape=jax.ShapeDtypeStruct((b_pad, n_pad), out_dtype),
        grid=grid,
        in_specs=[
            pl.BlockSpec((tb, tk), lambda i, j, k: (i, k)),   # x tile
            pl.BlockSpec((tk, tn), lambda i, j, k: (k, j)),   # W tile
        ],
        out_specs=pl.BlockSpec((tb, tn), lambda i, j, k: (i, j)),
        scratch_shapes=[pltpu.VMEM((tb, tn), jnp.float32)],
        compiler_params=pltpu.CompilerParams(
            dimension_semantics=("parallel", "parallel", "arbitrary")),
        cost_estimate=cost,
    )(x_p, w_p)


# ----------------------------------------------------------------------------
# Path 2: two-stage kernel  y = (x @ A) @ B  with rank padded to 128 and
#         xa hoisted into VMEM scratch (computed once per batch tile).
# ----------------------------------------------------------------------------
def _two_stage_kernel(x_ref, a_ref, b_ref, o_ref, xa_ref):
    # x: (tb, K), a: (K, r_pad), b: (r_pad, tn), xa scratch: (tb, r_pad) f32.
    @pl.when(pl.program_id(1) == 0)
    def _():
        xa_ref[...] = jnp.dot(x_ref[...], a_ref[...],
                              preferred_element_type=jnp.float32)

    o_ref[...] = jnp.dot(xa_ref[...].astype(b_ref.dtype), b_ref[...],
                         preferred_element_type=jnp.float32).astype(o_ref.dtype)


def _two_stage_matmul(x_p, a_p, b_p, out_dtype, tb, tn):
    # TODO(synk): K-tile the x block too (needed only for very large in_features
    # on v7x's 64 MiB VMEM); the first-stage block here holds the full K.
    b_pad, k = x_p.shape
    r_pad, n_pad = b_p.shape
    grid = (b_pad // tb, n_pad // tn)
    out_isz = np.dtype(out_dtype).itemsize
    cost = pl.CostEstimate(
        flops=2 * b_pad * k * r_pad + 2 * b_pad * r_pad * n_pad,
        transcendentals=0,
        bytes_accessed=(x_p.size * x_p.dtype.itemsize
                        + a_p.size * a_p.dtype.itemsize
                        + b_p.size * b_p.dtype.itemsize
                        + b_pad * n_pad * out_isz))
    return pl.pallas_call(
        _two_stage_kernel,
        out_shape=jax.ShapeDtypeStruct((b_pad, n_pad), out_dtype),
        grid=grid,
        in_specs=[
            pl.BlockSpec((tb, k), lambda i, j: (i, 0)),        # x batch tile
            pl.BlockSpec((k, r_pad), lambda i, j: (0, 0)),     # A (resident)
            pl.BlockSpec((r_pad, tn), lambda i, j: (0, j)),    # B out tile
        ],
        out_specs=pl.BlockSpec((tb, tn), lambda i, j: (i, j)),
        scratch_shapes=[pltpu.VMEM((tb, r_pad), jnp.float32)],
        compiler_params=pltpu.CompilerParams(
            dimension_semantics=("parallel", "arbitrary")),
        cost_estimate=cost,
    )(x_p, a_p, b_p)


# ----------------------------------------------------------------------------
# Full forward (single jitted graph)
# ----------------------------------------------------------------------------
@functools.partial(jax.jit, static_argnames=("path", "out_dtype", "compute_dtype"))
def ttt_layer_forward(x, factors, path="auto", out_dtype=None, compute_dtype=None):
    """TTTLayer.forward: y = x @ tt_to_tensor(factors).reshape(x.shape[1], -1).

    path: "auto" | "dense" | "two_stage".
    compute_dtype / out_dtype default to x.dtype (f32 parity with PyTorch);
    pass jnp.bfloat16 to halve HBM traffic when the consumer tolerates it.
    """
    batch, in_features = x.shape
    shape = tuple(int(f.shape[1]) for f in factors)
    total = 1
    for s in shape:
        total *= s
    assert total % in_features == 0, \
        "prod(tt shape) must be divisible by in_features"
    out_features = total // in_features

    out_dtype = np.dtype(x.dtype) if out_dtype is None else np.dtype(out_dtype)
    compute_dtype = (np.dtype(x.dtype) if compute_dtype is None
                     else np.dtype(compute_dtype))

    boundary = _mode_boundary(shape, in_features)
    can_split = boundary is not None and 0 < boundary < len(shape)
    if path == "dense":
        use_dense = True
    elif path == "two_stage":
        # Fall back to the dense fold when in_features is not at a TT mode
        # boundary (keeps the original PyTorch reshape semantics in all cases).
        use_dense = not can_split
    else:  # "auto"
        use_dense = (in_features * out_features <= _DENSE_W_MAX_ELEMS) or not can_split

    # ---- tile selection: minimal-padding multiples of (sublane, lane) units --
    sub_unit = 16 if compute_dtype == np.dtype(jnp.bfloat16) else 8
    tb, b_pad = _pick_tile(batch, sub_unit, _MAX_TB)
    tn, n_pad = _pick_tile(out_features, 128, _MAX_TN)

    # v7x has two TensorCores sharded over "parallel" grid axes: if the grid
    # would collapse to a single program along them, split one when possible.
    if use_dense:
        if b_pad // tb == 1 and n_pad // tn == 1:
            if tn % 256 == 0:
                tn //= 2
            elif tb % (2 * sub_unit) == 0:
                tb //= 2
    else:
        if b_pad // tb == 1 and tb % (2 * sub_unit) == 0:
            tb //= 2

    xk = x.astype(compute_dtype)

    if use_dense:
        # Fold the TT chain into the dense W inside the jit (tiny contractions,
        # never touches the kernel) and run one lane-dense x @ W matmul.
        W = tt_to_tensor(factors).reshape(in_features, -1).astype(compute_dtype)
        if in_features <= _MAX_TK:
            tk, k_pad = in_features, in_features
        else:
            tk, k_pad = _pick_tile(in_features, 128, _MAX_TK)

        if b_pad == batch and k_pad == in_features:
            x_p = xk
        else:
            x_p = jnp.pad(xk, ((0, b_pad - batch), (0, k_pad - in_features)))
        if k_pad == in_features and n_pad == out_features:
            w_p = W
        else:
            w_p = jnp.pad(W, ((0, k_pad - in_features), (0, n_pad - out_features)))
        y_pad = _dense_matmul(x_p, w_p, out_dtype, tb, tn, tk)
    else:
        # W == A @ B is never materialized; weight bytes are O((in + out) * r_pad).
        A, Bm = tt_split(factors, in_features)
        r = A.shape[1]
        r_pad = _round_up(r, 128)            # lane-dense rank dim (zero-padded)
        A = A.astype(compute_dtype)
        Bm = Bm.astype(compute_dtype)
        a_p = A if r_pad == r else jnp.pad(A, ((0, 0), (0, r_pad - r)))
        if r_pad == r and n_pad == out_features:
            b_p = Bm
        else:
            b_p = jnp.pad(Bm, ((0, r_pad - r), (0, n_pad - out_features)))
        x_p = xk if b_pad == batch else jnp.pad(xk, ((0, b_pad - batch), (0, 0)))
        y_pad = _two_stage_matmul(x_p, a_p, b_p, out_dtype, tb, tn)

    if b_pad == batch and n_pad == out_features:
        return y_pad
    return y_pad[:batch, :out_features]


# ----------------------------------------------------------------------------
# Main
# ----------------------------------------------------------------------------
if __name__ == "__main__":
    key = jax.random.PRNGKey(0)
    k_f, k_x, k_f2, k_x2 = jax.random.split(key, 4)

    # ---- Test 1: small layer (exercises the dense-fold path) ---------------
    tt_shape = (4, 8, 4, 8)          # prod = 1024
    rank = 2
    batch = 8
    in_features = 32                 # -> out_features = 32

    factors = make_tt_factors(k_f, tt_shape, rank)
    x = jax.random.normal(k_x, (batch, in_features), dtype=jnp.float32)

    y = ttt_layer_forward(x, factors)
    y = jax.block_until_ready(y)
    out_features = 1024 // in_features
    assert y.shape == (batch, out_features)
    assert y.dtype == x.dtype

    W_full = tt_to_tensor(factors).reshape(in_features, -1)
    y_ref = x @ W_full
    assert jnp.allclose(y, y_ref, atol=1e-4, rtol=5e-2)

    # ---- Test 2: larger layer (exercises the two-stage streaming path) -----
    tt_shape2 = (8, 16, 16, 32)      # prod = 65536
    batch2 = 16
    in_features2 = 128               # 8*16 -> out_features = 512
    factors2 = make_tt_factors(k_f2, tt_shape2, rank)
    x2 = jax.random.normal(k_x2, (batch2, in_features2), dtype=jnp.float32)

    y2 = jax.block_until_ready(ttt_layer_forward(x2, factors2, path="two_stage"))
    assert y2.shape == (batch2, 65536 // in_features2)
    W2 = tt_to_tensor(factors2).reshape(in_features2, -1)
    y2_ref = x2 @ W2
    assert jnp.allclose(y2, y2_ref, atol=1e-4, rtol=5e-2)

    # Same layer through the default (auto -> dense fold) path must agree too.
    y2d = jax.block_until_ready(ttt_layer_forward(x2, factors2))
    assert jnp.allclose(y2d, y2_ref, atol=1e-4, rtol=5e-2)

    print("KERNEL_OK")
</pallas_src>

<mosaic_0001>
module attributes {stable_mosaic.version = 11 : i64} {
  func.func @_dense_matmul_kernel(%arg0: i32, %arg1: i32, %arg2: i32, %arg3: memref<8x32xf32, #tpu.memory_space<vmem>>, %arg4: memref<32x128xf32, #tpu.memory_space<vmem>>, %arg5: memref<8x128xf32, #tpu.memory_space<vmem>>, %arg6: memref<8x128xf32, #tpu.memory_space<vmem>>) attributes {dimension_semantics = [#tpu.dimension_semantics<parallel>, #tpu.dimension_semantics<parallel>, #tpu.dimension_semantics<arbitrary>], iteration_bounds = array<i64: 1, 1, 1>, scalar_prefetch = 0 : i64, scratch_operands = 1 : i64, tpu.core_type = #tpu.core_type<tc>, window_params = [{transform_indices = @transform_0, window_bounds = array<i64: 8, 32>}, {transform_indices = @transform_1, window_bounds = array<i64: 32, 128>}, {transform_indices = @transform_2, window_bounds = array<i64: 8, 128>}]} {
    %c0_i32 = arith.constant 0 : i32
    %0 = arith.cmpi eq, %arg2, %c0_i32 : i32
    %1 = arith.extui %0 : i1 to i32
    %c0_i32_0 = arith.constant 0 : i32
    %2 = arith.cmpi ne, %1, %c0_i32_0 : i32
    scf.if %2 {
      %cst_10 = arith.constant 0.000000e+00 : f32
      %12 = vector.broadcast %cst_10 : f32 to vector<8x128xf32>
      %c0_11 = arith.constant 0 : index
      %c0_12 = arith.constant 0 : index
      %13 = vector.load %arg6[%c0_11, %c0_12] : memref<8x128xf32, #tpu.memory_space<vmem>>, vector<8x128xf32>
      tpu.vector_store %arg6[%c0_11, %c0_12], %12 {strides = array<i32>} : memref<8x128xf32, #tpu.memory_space<vmem>>, vector<8x128xf32>,
    } else {
    }
    %c0 = arith.constant 0 : index
    %c0_1 = arith.constant 0 : index
    %3 = vector.load %arg6[%c0, %c0_1] : memref<8x128xf32, #tpu.memory_space<vmem>>, vector<8x128xf32>
    %c0_2 = arith.constant 0 : index
    %c0_3 = arith.constant 0 : index
    %4 = vector.load %arg3[%c0_2, %c0_3] : memref<8x32xf32, #tpu.memory_space<vmem>>, vector<8x32xf32>
    %c0_4 = arith.constant 0 : index
    %c0_5 = arith.constant 0 : index
    %5 = vector.load %arg4[%c0_4, %c0_5] : memref<32x128xf32, #tpu.memory_space<vmem>>, vector<32x128xf32>
    %cst = arith.constant dense<0.000000e+00> : vector<8x128xf32>
    %6 = tpu.matmul %4, %5, %cst {dimension_numbers = #tpu.dot_dimension_numbers<[1], [0], [0], [1], [0, 0, 1, 1], [], []>} : vector<8x32xf32>, vector<32x128xf32>, vector<8x128xf32> -> vector<8x128xf32>
    %7 = arith.addf %3, %6 : vector<8x128xf32>
    %c0_6 = arith.constant 0 : index
    %c0_7 = arith.constant 0 : index
    %8 = vector.load %arg6[%c0_6, %c0_7] : memref<8x128xf32, #tpu.memory_space<vmem>>, vector<8x128xf32>
    tpu.vector_store %arg6[%c0_6, %c0_7], %7 {strides = array<i32>} : memref<8x128xf32, #tpu.memory_space<vmem>>, vector<8x128xf32>,
    %c0_i32_8 = arith.constant 0 : i32
    %9 = arith.cmpi eq, %arg2, %c0_i32_8 : i32
    %10 = arith.extui %9 : i1 to i32
    %c0_i32_9 = arith.constant 0 : i32
    %11 = arith.cmpi ne, %10, %c0_i32_9 : i32
    scf.if %11 {
      %c0_10 = arith.constant 0 : index
      %c0_11 = arith.constant 0 : index
      %12 = vector.load %arg6[%c0_10, %c0_11] : memref<8x128xf32, #tpu.memory_space<vmem>>, vector<8x128xf32>
      %c0_12 = arith.constant 0 : index
      %c0_13 = arith.constant 0 : index
      %13 = vector.load %arg5[%c0_12, %c0_13] : memref<8x128xf32, #tpu.memory_space<vmem>>, vector<8x128xf32>
      tpu.vector_store %arg5[%c0_12, %c0_13], %12 {strides = array<i32>} : memref<8x128xf32, #tpu.memory_space<vmem>>, vector<8x128xf32>,
    } else {
    }
    return
  }
  func.func @transform_0(%arg0: i32, %arg1: i32, %arg2: i32) -> (i32, i32) {
    %c0_i32 = arith.constant 0 : i32
    return %arg0, %arg2 : i32, i32
  }
  func.func @transform_1(%arg0: i32, %arg1: i32, %arg2: i32) -> (i32, i32) {
    %c0_i32 = arith.constant 0 : i32
    return %arg2, %arg1 : i32, i32
  }
  func.func @transform_2(%arg0: i32, %arg1: i32, %arg2: i32) -> (i32, i32) {
    %c0_i32 = arith.constant 0 : i32
    return %arg0, %arg1 : i32, i32
  }
}

</mosaic_0001>

<bundles_post_ra>
// kernel: ttt_layer_forward.1
= control target key start
LH: loop header
LB: loop body
LE: loop exit
PB: predicated region body
PF: predicated region fallthrough
CT: control target
= control target key end

     0   :  { %s132_s0 = inlined_call_operand.vmem [shape: f32[8,32], index: 0, kind: input, shape index: {}]   ;;  %s133_s1 = inlined_call_operand.vmem [shape: f32[32,128], index: 1, kind: input, shape index: {}]   ;;  %s134_s2 = inlined_call_operand.hbm [shape: f32[8,128], index: 2, kind: output, shape index: {}]  }
   0x1   :  { %v22_v0 = vld [vmem:[%s133_s1 + $0x18] sm:$0xff]  ;;  %v21_v1 = vld [vmem:[%s133_s1 + $0x10] sm:$0xff] }
   0x2   :  { %39 = vmatpush.msra.mxu0 %v22_v0 }
   0x3   :  { %7 = vsyncpa [#allocation4], 0  ;;  %v20_v2 = vld [vmem:[%s133_s1 + $0x8] sm:$0xff]  ;;  %v19_v3 = vld [vmem:[%s133_s1] sm:$0xff]  ;;  %vm23_vm0 = vcmask 261120   ;;  %s98_s19 = smov [#allocation3]  }
   0x4   :  { %40 = vmatpush.msra.mxu0 %v21_v1  ;;  %v18_v4 = vld [vmem:[%s132_s0] sm:$0xff]  ;;  %s59_s20 = sshll.u32 %s98_s19, 4  ;;  %s61_s23 = sshll.u32 %s134_s2, 4  ;;  %s60_s20 = int_to_ptr.vmem [resolvable:$true] %s59_s20  ;;  %s62_s23 = int_to_ptr.hbm [resolvable:$true] %s61_s23 }
   0x6   :  { %41 = vmatpush.msra.mxu0 %v20_v2 }
   0x8   :  { %42 = vmatpush.msra.mxu0 %v19_v3 }
   0x9   :  { %70 = vmatmul.msk.f32.vlgmr.msra.gmra.mxu0 %vm23_vm0, %v18_v4 }
  0x86   :  { %v44_v5 = vpop.f32.mrf.mxu0 }
  0x87   :  { %53 = vst [vmem:[#allocation3] sm:$0xff] %v44_v5 }
  0x88   :  { %64 = dma.vmem_to_hbm [thread:$0]  %s60_s20, 128, %s62_s23, [#allocation4]  }
  0x89   :  { %96 = dma.done.wait [#allocation4], 128  }
  0x8a   :  { %97 = vsyncadd [#allocation4], 4294967168 }
  0x8b   :  { %69 = vsyncpa [#allocation4], 1 }

</bundles_post_ra>
